<compile_context>
chip_gen: v6e
topology: v6e:2x2x1
jax: 0.10.0
libtpu: 0.0.40
codegen_flags: <defaults>
</compile_context>

<pallas_src>
from math import sqrt

import jax
import jax.numpy as jnp
from jax.experimental import pallas as pl
from jax.experimental.pallas import tpu as pltpu


_LANE = 128
_TILE_QUANT = 16            # row-tile quantum: full vregs for f32 & bf16 tiles
_MIB = 1024 * 1024

# Flipped off (once) if this jax build rejects pipeline_mode on a BlockSpec.
_SINGLE_BUFFER_WEIGHTS = True


def _round_up(n: int, m: int) -> int:
    return ((n + m - 1) // m) * m


def _cdiv(a: int, b: int) -> int:
    return -(-a // b)


# ---------------------------------------------------------------------------
# Kernel: three chained (bf16 x bf16 -> f32) matmuls + bias + sigmoid.
# ---------------------------------------------------------------------------
def _end_kernel(x_ref, w1_ref, b1_ref, w2_ref, b2_ref, w3_ref, b3_ref, o_ref):
    # In-kernel f32 -> bf16 cast (VPU slot is idle); accumulation stays f32.
    x = x_ref[...].astype(jnp.bfloat16)
    h1 = jnp.dot(x, w1_ref[...], preferred_element_type=jnp.float32)
    h1 = jax.nn.sigmoid(h1 + b1_ref[...])

    h2 = jnp.dot(h1.astype(jnp.bfloat16), w2_ref[...],
                 preferred_element_type=jnp.float32)
    h2 = jax.nn.sigmoid(h2 + b2_ref[...])

    # fc3 keeps its true output width P: the narrow matmul N-dim and masked
    # store are irrelevant next to the 128/P-times-smaller HBM writeback.
    h3 = jnp.dot(h2.astype(jnp.bfloat16), w3_ref[...],
                 preferred_element_type=jnp.float32)
    o_ref[...] = jax.nn.sigmoid(h3 + b3_ref[...])


# ---------------------------------------------------------------------------
# One-time parameter preparation (hoisted out of the per-call path).
# ---------------------------------------------------------------------------
def prepare_end_params(w1, b1, w2, b2, w3, b3):
    """Pad hidden dims to 128 lanes and cast matmul inputs to bf16, once."""
    Np, H1 = w1.shape
    H1b, H2 = w2.shape
    H2b, P = w3.shape
    assert H1 == H1b and H2 == H2b, "inconsistent Linear shapes"
    H1_p = _round_up(H1, _LANE)
    H2_p = _round_up(H2, _LANE)
    # Contraction dim of fc1 (Np) and output dim of fc3 (P) stay unpadded.
    w1p = jnp.pad(w1, ((0, 0), (0, H1_p - H1))).astype(jnp.bfloat16)
    w2p = jnp.pad(w2, ((0, H1_p - H1), (0, H2_p - H2))).astype(jnp.bfloat16)
    w3p = jnp.pad(w3, ((0, H2_p - H2), (0, 0))).astype(jnp.bfloat16)
    b1p = jnp.pad(jnp.reshape(b1, (1, H1)), ((0, 0), (0, H1_p - H1))).astype(jnp.float32)
    b2p = jnp.pad(jnp.reshape(b2, (1, H2)), ((0, 0), (0, H2_p - H2))).astype(jnp.float32)
    b3p = jnp.reshape(b3, (1, P)).astype(jnp.float32)
    return (w1p, b1p, w2p, b2p, w3p, b3p)


# ---------------------------------------------------------------------------
# VMEM-budget-aware L tiling.
# ---------------------------------------------------------------------------
def _vmem_capacity_bytes() -> int:
    try:
        return int(pltpu.get_tpu_info().vmem_capacity_bytes)
    except Exception:
        return 64 * _MIB          # v7x floor; conservative for v5e/v6e


def _pick_tile_l(L: int, Np: int, P: int, params_bytes: int):
    cap = _vmem_capacity_bytes()
    budget = int(cap * 0.40)                        # tiles + weights working set
    avail = max(budget - 2 * params_bytes, 2 * _MIB)  # worst case: 2x-buffered weights
    row_bytes = 2 * (Np + P) * 4                    # double-buffered f32 x-row + out-row
    tile_l = avail // row_bytes
    tile_l = max(_TILE_QUANT, (tile_l // _TILE_QUANT) * _TILE_QUANT)
    tile_l = min(tile_l, _round_up(L, _TILE_QUANT), 4096)
    # Guarantee >=2 grid steps (DMA/compute overlap; feeds v7x's 2nd core) and
    # ~4 steps for large L, but never shrink tiles below 256 rows just for
    # step count (single-core v5e/v6e: big tiles amortize ~0.35us/step).
    if L >= 4 * 256:
        tile_l = min(tile_l, max(256, _round_up(_cdiv(L, 4), _TILE_QUANT)))
    elif L >= 2 * _TILE_QUANT:
        tile_l = min(tile_l, max(_TILE_QUANT, _round_up(_cdiv(L, 2), _TILE_QUANT)))
    return int(tile_l), cap


# ---------------------------------------------------------------------------
# Forward pass wrapper.
# ---------------------------------------------------------------------------
def end_forward(x, params, *, tile_l=None):
    """Forward of `End`.

    x: (1, L, H, W) float32 (the module's reshape contract implies dim0 == 1).
    params: output of prepare_end_params().
    Returns (L, P) float32.
    """
    w1p, b1p, w2p, b2p, w3p, b3p = params
    if x.shape[0] != 1:
        raise ValueError("End.forward reshapes (1, L, H, W) -> (L, H*W); dim0 must be 1.")
    L = x.shape[1]
    Np = x.shape[2] * x.shape[3]
    if w1p.shape[0] != Np:
        raise ValueError(f"fc1 expects Np={w1p.shape[0]}, got H*W={Np}")
    H1_p = w1p.shape[1]
    H2_p = w2p.shape[1]
    P = w3p.shape[1]

    params_bytes = sum(int(a.size) * a.dtype.itemsize for a in params)
    if tile_l is None:
        tile_l, vmem_cap = _pick_tile_l(L, Np, P, params_bytes)
    else:
        vmem_cap = _vmem_capacity_bytes()
    tile_l = max(_TILE_QUANT, _round_up(int(tile_l), _TILE_QUANT))

    L_p = _round_up(L, tile_l)
    grid = (L_p // tile_l,)

    x2d = jnp.reshape(x, (L, Np))
    if L_p != L:
        # Only the ragged tail gets zero rows; no dtype round trip, no Np pad.
        x2d = jnp.pad(x2d, ((0, L_p - L), (0, 0)))

    vmem_limit = int(vmem_cap * 0.70)

    cost = pl.CostEstimate(
        flops=2 * L_p * (Np * H1_p + H1_p * H2_p + H2_p * P),
        transcendentals=L_p * (H1_p + H2_p + P),
        bytes_accessed=L_p * Np * 4 + params_bytes + L_p * P * 4,
    )

    def _run(single_buffer_weights: bool):
        if single_buffer_weights:
            # Constant index_map -> DMA'd once; single buffer halves VMEM use.
            resident = lambda shape: pl.BlockSpec(
                shape, lambda i: (0, 0), pipeline_mode=pl.Buffered(1))
        else:
            resident = lambda shape: pl.BlockSpec(shape, lambda i: (0, 0))
        return pl.pallas_call(
            _end_kernel,
            out_shape=jax.ShapeDtypeStruct((L_p, P), jnp.float32),
            grid=grid,
            in_specs=[
                # Pipelined f32 x tile; last dim == full array dim (legal even
                # when Np is not a multiple of 128).
                pl.BlockSpec((tile_l, Np), lambda i: (i, 0)),
                resident((Np, H1_p)), resident((1, H1_p)),
                resident((H1_p, H2_p)), resident((1, H2_p)),
                resident((H2_p, P)), resident((1, P)),
            ],
            # True-width output block: writeback traffic is P lanes, not 128.
            out_specs=pl.BlockSpec((tile_l, P), lambda i: (i, 0)),
            compiler_params=pltpu.CompilerParams(
                dimension_semantics=("parallel",),
                vmem_limit_bytes=vmem_limit),
            cost_estimate=cost,
        )(x2d, w1p, b1p, w2p, b2p, w3p, b3p)

    global _SINGLE_BUFFER_WEIGHTS
    if _SINGLE_BUFFER_WEIGHTS:
        try:
            out = _run(True)
        except Exception:
            # This build rejects pipeline_mode on a top-level BlockSpec:
            # fall back to default double-buffered resident weights.
            _SINGLE_BUFFER_WEIGHTS = False
            out = _run(False)
    else:
        out = _run(False)

    if L_p != L:
        out = out[:L]
    return out


# ---------------------------------------------------------------------------
# Reference / init helpers.
# ---------------------------------------------------------------------------
def init_linear_params(key, fan_in, fan_out):
    # PyTorch nn.Linear default init: U(-1/sqrt(fan_in), 1/sqrt(fan_in)).
    kw, kb = jax.random.split(key)
    bound = 1.0 / sqrt(fan_in)
    # Stored transposed relative to PyTorch (in, out) so the kernel does x @ W.
    w = jax.random.uniform(kw, (fan_in, fan_out), jnp.float32, -bound, bound)
    b = jax.random.uniform(kb, (1, fan_out), jnp.float32, -bound, bound)
    return w, b


def reference_forward(x, w1, b1, w2, b2, w3, b3):
    L = x.shape[1]
    Np = x.shape[2] * x.shape[3]
    x2d = jnp.reshape(x, (L, Np))
    h1 = jax.nn.sigmoid(x2d @ w1 + b1)
    h2 = jax.nn.sigmoid(h1 @ w2 + b2)
    return jax.nn.sigmoid(h2 @ w3 + b3)


if __name__ == "__main__":
    # Small shapes consistent with End(P, Np): x is (1, L, H, W), Np = H*W.
    P = 4
    H = W = 16
    Np = H * W
    L = 48

    key = jax.random.PRNGKey(0)
    kx, k1, k2, k3 = jax.random.split(key, 4)

    x = jax.random.normal(kx, (1, L, H, W), jnp.float32)
    w1, b1 = init_linear_params(k1, Np, 100)
    w2, b2 = init_linear_params(k2, 100, 30)
    w3, b3 = init_linear_params(k3, 30, P)

    params = prepare_end_params(w1, b1, w2, b2, w3, b3)   # one-time prep
    ref = reference_forward(x, w1, b1, w2, b2, w3, b3)

    # Default (VMEM-budget) tiling: here tile_l=32 -> 2-step grid with a
    # padded ragged tail (exercises the L-pad + row-slice path).
    out = jax.block_until_ready(end_forward(x, params))
    assert out.shape == (L, P), out.shape
    err = float(jnp.max(jnp.abs(out - ref)))
    # bf16 matmul inputs (f32 accumulation) -> relaxed tolerance vs f32 ref.
    assert jnp.allclose(out, ref, atol=1e-2, rtol=0.0), f"max err {err}"

    # Explicit tile that divides L exactly (3-step grid, no row padding).
    out2 = jax.block_until_ready(end_forward(x, params, tile_l=16))
    err2 = float(jnp.max(jnp.abs(out2 - ref)))
    assert out2.shape == (L, P), out2.shape
    assert jnp.allclose(out2, ref, atol=1e-2, rtol=0.0), f"max err {err2}"

    print("KERNEL_OK")
</pallas_src>

<mosaic_0001>
module attributes {stable_mosaic.version = 11 : i64} {
  func.func @_end_kernel(%arg0: i32, %arg1: memref<32x256xf32, #tpu.memory_space<vmem>>, %arg2: memref<256x128xbf16, #tpu.memory_space<vmem>>, %arg3: memref<1x128xf32, #tpu.memory_space<vmem>>, %arg4: memref<128x128xbf16, #tpu.memory_space<vmem>>, %arg5: memref<1x128xf32, #tpu.memory_space<vmem>>, %arg6: memref<128x4xbf16, #tpu.memory_space<vmem>>, %arg7: memref<1x4xf32, #tpu.memory_space<vmem>>, %arg8: memref<32x4xf32, #tpu.memory_space<vmem>>) attributes {dimension_semantics = [#tpu.dimension_semantics<parallel>], iteration_bounds = array<i64: 2>, scalar_prefetch = 0 : i64, scratch_operands = 0 : i64, tpu.core_type = #tpu.core_type<tc>, window_params = [{transform_indices = @transform_0, window_bounds = array<i64: 32, 256>}, {pipeline_mode = #tpu.pipeline_mode<synchronous>, transform_indices = @transform_1, window_bounds = array<i64: 256, 128>}, {pipeline_mode = #tpu.pipeline_mode<synchronous>, transform_indices = @transform_2, window_bounds = array<i64: 1, 128>}, {pipeline_mode = #tpu.pipeline_mode<synchronous>, transform_indices = @transform_3, window_bounds = array<i64: 128, 128>}, {pipeline_mode = #tpu.pipeline_mode<synchronous>, transform_indices = @transform_4, window_bounds = array<i64: 1, 128>}, {pipeline_mode = #tpu.pipeline_mode<synchronous>, transform_indices = @transform_5, window_bounds = array<i64: 128, 4>}, {pipeline_mode = #tpu.pipeline_mode<synchronous>, transform_indices = @transform_6, window_bounds = array<i64: 1, 4>}, {transform_indices = @transform_7, window_bounds = array<i64: 32, 4>}]} {
    %c0 = arith.constant 0 : index
    %c0_0 = arith.constant 0 : index
    %0 = vector.load %arg1[%c0, %c0_0] : memref<32x256xf32, #tpu.memory_space<vmem>>, vector<32x256xf32>
    %1 = arith.truncf %0 : vector<32x256xf32> to vector<32x256xbf16>
    %c0_1 = arith.constant 0 : index
    %c0_2 = arith.constant 0 : index
    %2 = vector.load %arg2[%c0_1, %c0_2] : memref<256x128xbf16, #tpu.memory_space<vmem>>, vector<256x128xbf16>
    %cst = arith.constant dense<0.000000e+00> : vector<32x128xf32>
    %3 = tpu.matmul %1, %2, %cst {dimension_numbers = #tpu.dot_dimension_numbers<[1], [0], [0], [1], [0, 0, 1, 1], [], []>} : vector<32x256xbf16>, vector<256x128xbf16>, vector<32x128xf32> -> vector<32x128xf32>
    %c0_3 = arith.constant 0 : index
    %c0_4 = arith.constant 0 : index
    %4 = vector.load %arg3[%c0_3, %c0_4] : memref<1x128xf32, #tpu.memory_space<vmem>>, vector<1x128xf32>
    %5 = vector.broadcast %4 : vector<1x128xf32> to vector<32x128xf32>
    %6 = arith.addf %3, %5 : vector<32x128xf32>
    %7 = arith.negf %6 : vector<32x128xf32>
    %8 = math.exp %7 : vector<32x128xf32>
    %cst_5 = arith.constant 1.000000e+00 : f32
    %9 = vector.broadcast %cst_5 : f32 to vector<32x128xf32>
    %10 = arith.addf %9, %8 : vector<32x128xf32>
    %11 = arith.divf %9, %10 : vector<32x128xf32>
    %12 = arith.truncf %11 : vector<32x128xf32> to vector<32x128xbf16>
    %c0_6 = arith.constant 0 : index
    %c0_7 = arith.constant 0 : index
    %13 = vector.load %arg4[%c0_6, %c0_7] : memref<128x128xbf16, #tpu.memory_space<vmem>>, vector<128x128xbf16>
    %cst_8 = arith.constant dense<0.000000e+00> : vector<32x128xf32>
    %14 = tpu.matmul %12, %13, %cst_8 {dimension_numbers = #tpu.dot_dimension_numbers<[1], [0], [0], [1], [0, 0, 1, 1], [], []>} : vector<32x128xbf16>, vector<128x128xbf16>, vector<32x128xf32> -> vector<32x128xf32>
    %c0_9 = arith.constant 0 : index
    %c0_10 = arith.constant 0 : index
    %15 = vector.load %arg5[%c0_9, %c0_10] : memref<1x128xf32, #tpu.memory_space<vmem>>, vector<1x128xf32>
    %16 = vector.broadcast %15 : vector<1x128xf32> to vector<32x128xf32>
    %17 = arith.addf %14, %16 : vector<32x128xf32>
    %18 = arith.negf %17 : vector<32x128xf32>
    %19 = math.exp %18 : vector<32x128xf32>
    %cst_11 = arith.constant 1.000000e+00 : f32
    %20 = vector.broadcast %cst_11 : f32 to vector<32x128xf32>
    %21 = arith.addf %20, %19 : vector<32x128xf32>
    %22 = arith.divf %20, %21 : vector<32x128xf32>
    %23 = arith.truncf %22 : vector<32x128xf32> to vector<32x128xbf16>
    %c0_12 = arith.constant 0 : index
    %c0_13 = arith.constant 0 : index
    %24 = vector.load %arg6[%c0_12, %c0_13] : memref<128x4xbf16, #tpu.memory_space<vmem>>, vector<128x4xbf16>
    %cst_14 = arith.constant dense<0.000000e+00> : vector<32x4xf32>
    %25 = tpu.matmul %23, %24, %cst_14 {dimension_numbers = #tpu.dot_dimension_numbers<[1], [0], [0], [1], [0, 0, 1, 1], [], []>} : vector<32x128xbf16>, vector<128x4xbf16>, vector<32x4xf32> -> vector<32x4xf32>
    %c0_15 = arith.constant 0 : index
    %c0_16 = arith.constant 0 : index
    %26 = vector.load %arg7[%c0_15, %c0_16] : memref<1x4xf32, #tpu.memory_space<vmem>>, vector<1x4xf32>
    %27 = vector.broadcast %26 : vector<1x4xf32> to vector<32x4xf32>
    %28 = arith.addf %25, %27 : vector<32x4xf32>
    %29 = arith.negf %28 : vector<32x4xf32>
    %30 = math.exp %29 : vector<32x4xf32>
    %cst_17 = arith.constant 1.000000e+00 : f32
    %31 = vector.broadcast %cst_17 : f32 to vector<32x4xf32>
    %32 = arith.addf %31, %30 : vector<32x4xf32>
    %33 = arith.divf %31, %32 : vector<32x4xf32>
    %c0_18 = arith.constant 0 : index
    %c0_19 = arith.constant 0 : index
    %34 = vector.load %arg8[%c0_18, %c0_19] : memref<32x4xf32, #tpu.memory_space<vmem>>, vector<32x4xf32>
    tpu.vector_store %arg8[%c0_18, %c0_19], %33 {strides = array<i32>} : memref<32x4xf32, #tpu.memory_space<vmem>>, vector<32x4xf32>,
    return
  }
  func.func @transform_0(%arg0: i32) -> (i32, i32) {
    %c0_i32 = arith.constant 0 : i32
    %c0_i32_0 = arith.constant 0 : i32
    return %arg0, %c0_i32 : i32, i32
  }
  func.func @transform_1(%arg0: i32) -> (i32, i32) {
    %c0_i32 = arith.constant 0 : i32
    %c0_i32_0 = arith.constant 0 : i32
    %c0_i32_1 = arith.constant 0 : i32
    return %c0_i32, %c0_i32_0 : i32, i32
  }
  func.func @transform_2(%arg0: i32) -> (i32, i32) {
    %c0_i32 = arith.constant 0 : i32
    %c0_i32_0 = arith.constant 0 : i32
    %c0_i32_1 = arith.constant 0 : i32
    return %c0_i32, %c0_i32_0 : i32, i32
  }
  func.func @transform_3(%arg0: i32) -> (i32, i32) {
    %c0_i32 = arith.constant 0 : i32
    %c0_i32_0 = arith.constant 0 : i32
    %c0_i32_1 = arith.constant 0 : i32
    return %c0_i32, %c0_i32_0 : i32, i32
  }
  func.func @transform_4(%arg0: i32) -> (i32, i32) {
    %c0_i32 = arith.constant 0 : i32
    %c0_i32_0 = arith.constant 0 : i32
    %c0_i32_1 = arith.constant 0 : i32
    return %c0_i32, %c0_i32_0 : i32, i32
  }
  func.func @transform_5(%arg0: i32) -> (i32, i32) {
    %c0_i32 = arith.constant 0 : i32
    %c0_i32_0 = arith.constant 0 : i32
    %c0_i32_1 = arith.constant 0 : i32
    return %c0_i32, %c0_i32_0 : i32, i32
  }
  func.func @transform_6(%arg0: i32) -> (i32, i32) {
    %c0_i32 = arith.constant 0 : i32
    %c0_i32_0 = arith.constant 0 : i32
    %c0_i32_1 = arith.constant 0 : i32
    return %c0_i32, %c0_i32_0 : i32, i32
  }
  func.func @transform_7(%arg0: i32) -> (i32, i32) {
    %c0_i32 = arith.constant 0 : i32
    %c0_i32_0 = arith.constant 0 : i32
    return %arg0, %c0_i32 : i32, i32
  }
}

module attributes {stable_mosaic.version = 11 : i64} {
  func.func @_end_kernel(%arg0: i32, %arg1: memref<32x256xf32, #tpu.memory_space<vmem>>, %arg2: memref<256x128xbf16, #tpu.memory_space<vmem>>, %arg3: memref<1x128xf32, #tpu.memory_space<vmem>>, %arg4: memref<128x128xbf16, #tpu.memory_space<vmem>>, %arg5: memref<1x128xf32, #tpu.memory_space<vmem>>, %arg6: memref<128x4xbf16, #tpu.memory_space<vmem>>, %arg7: memref<1x4xf32, #tpu.memory_space<vmem>>, %arg8: memref<32x4xf32, #tpu.memory_space<vmem>>) attributes {dimension_semantics = [#tpu.dimension_semantics<parallel>], iteration_bounds = array<i64: 2>, scalar_prefetch = 0 : i64, scratch_operands = 0 : i64, tpu.core_type = #tpu.core_type<tc>, window_params = [{transform_indices = @transform_0, window_bounds = array<i64: 32, 256>}, {pipeline_mode = #tpu.pipeline_mode<synchronous>, transform_indices = @transform_1, window_bounds = array<i64: 256, 128>}, {pipeline_mode = #tpu.pipeline_mode<synchronous>, transform_indices = @transform_2, window_bounds = array<i64: 1, 128>}, {pipeline_mode = #tpu.pipeline_mode<synchronous>, transform_indices = @transform_3, window_bounds = array<i64: 128, 128>}, {pipeline_mode = #tpu.pipeline_mode<synchronous>, transform_indices = @transform_4, window_bounds = array<i64: 1, 128>}, {pipeline_mode = #tpu.pipeline_mode<synchronous>, transform_indices = @transform_5, window_bounds = array<i64: 128, 4>}, {pipeline_mode = #tpu.pipeline_mode<synchronous>, transform_indices = @transform_6, window_bounds = array<i64: 1, 4>}, {transform_indices = @transform_7, window_bounds = array<i64: 32, 4>}]} {
    %c0 = arith.constant 0 : index
    %c0_0 = arith.constant 0 : index
    %0 = vector.load %arg1[%c0, %c0_0] : memref<32x256xf32, #tpu.memory_space<vmem>>, vector<32x256xf32>
    %1 = arith.truncf %0 : vector<32x256xf32> to vector<32x256xbf16>
    %c0_1 = arith.constant 0 : index
    %c0_2 = arith.constant 0 : index
    %2 = vector.load %arg2[%c0_1, %c0_2] : memref<256x128xbf16, #tpu.memory_space<vmem>>, vector<256x128xbf16>
    %cst = arith.constant dense<0.000000e+00> : vector<32x128xf32>
    %3 = tpu.matmul %1, %2, %cst {dimension_numbers = #tpu.dot_dimension_numbers<[1], [0], [0], [1], [0, 0, 1, 1], [], []>} : vector<32x256xbf16>, vector<256x128xbf16>, vector<32x128xf32> -> vector<32x128xf32>
    %c0_3 = arith.constant 0 : index
    %c0_4 = arith.constant 0 : index
    %4 = vector.load %arg3[%c0_3, %c0_4] : memref<1x128xf32, #tpu.memory_space<vmem>>, vector<1x128xf32>
    %5 = vector.broadcast %4 : vector<1x128xf32> to vector<32x128xf32>
    %6 = arith.addf %3, %5 : vector<32x128xf32>
    %7 = arith.negf %6 : vector<32x128xf32>
    %8 = math.exp %7 : vector<32x128xf32>
    %cst_5 = arith.constant 1.000000e+00 : f32
    %9 = vector.broadcast %cst_5 : f32 to vector<32x128xf32>
    %10 = arith.addf %9, %8 : vector<32x128xf32>
    %11 = arith.divf %9, %10 : vector<32x128xf32>
    %12 = arith.truncf %11 : vector<32x128xf32> to vector<32x128xbf16>
    %c0_6 = arith.constant 0 : index
    %c0_7 = arith.constant 0 : index
    %13 = vector.load %arg4[%c0_6, %c0_7] : memref<128x128xbf16, #tpu.memory_space<vmem>>, vector<128x128xbf16>
    %cst_8 = arith.constant dense<0.000000e+00> : vector<32x128xf32>
    %14 = tpu.matmul %12, %13, %cst_8 {dimension_numbers = #tpu.dot_dimension_numbers<[1], [0], [0], [1], [0, 0, 1, 1], [], []>} : vector<32x128xbf16>, vector<128x128xbf16>, vector<32x128xf32> -> vector<32x128xf32>
    %c0_9 = arith.constant 0 : index
    %c0_10 = arith.constant 0 : index
    %15 = vector.load %arg5[%c0_9, %c0_10] : memref<1x128xf32, #tpu.memory_space<vmem>>, vector<1x128xf32>
    %16 = vector.broadcast %15 : vector<1x128xf32> to vector<32x128xf32>
    %17 = arith.addf %14, %16 : vector<32x128xf32>
    %18 = arith.negf %17 : vector<32x128xf32>
    %19 = math.exp %18 : vector<32x128xf32>
    %cst_11 = arith.constant 1.000000e+00 : f32
    %20 = vector.broadcast %cst_11 : f32 to vector<32x128xf32>
    %21 = arith.addf %20, %19 : vector<32x128xf32>
    %22 = arith.divf %20, %21 : vector<32x128xf32>
    %23 = arith.truncf %22 : vector<32x128xf32> to vector<32x128xbf16>
    %c0_12 = arith.constant 0 : index
    %c0_13 = arith.constant 0 : index
    %24 = vector.load %arg6[%c0_12, %c0_13] : memref<128x4xbf16, #tpu.memory_space<vmem>>, vector<128x4xbf16>
    %cst_14 = arith.constant dense<0.000000e+00> : vector<32x4xf32>
    %25 = tpu.matmul %23, %24, %cst_14 {dimension_numbers = #tpu.dot_dimension_numbers<[1], [0], [0], [1], [0, 0, 1, 1], [], []>} : vector<32x128xbf16>, vector<128x4xbf16>, vector<32x4xf32> -> vector<32x4xf32>
    %c0_15 = arith.constant 0 : index
    %c0_16 = arith.constant 0 : index
    %26 = vector.load %arg7[%c0_15, %c0_16] : memref<1x4xf32, #tpu.memory_space<vmem>>, vector<1x4xf32>
    %27 = vector.broadcast %26 : vector<1x4xf32> to vector<32x4xf32>
    %28 = arith.addf %25, %27 : vector<32x4xf32>
    %29 = arith.negf %28 : vector<32x4xf32>
    %30 = math.exp %29 : vector<32x4xf32>
    %cst_17 = arith.constant 1.000000e+00 : f32
    %31 = vector.broadcast %cst_17 : f32 to vector<32x4xf32>
    %32 = arith.addf %31, %30 : vector<32x4xf32>
    %33 = arith.divf %31, %32 : vector<32x4xf32>
    %c0_18 = arith.constant 0 : index
    %c0_19 = arith.constant 0 : index
    %34 = vector.load %arg8[%c0_18, %c0_19] : memref<32x4xf32, #tpu.memory_space<vmem>>, vector<32x4xf32>
    tpu.vector_store %arg8[%c0_18, %c0_19], %33 {strides = array<i32>} : memref<32x4xf32, #tpu.memory_space<vmem>>, vector<32x4xf32>,
    return
  }
  func.func @transform_0(%arg0: i32) -> (i32, i32) {
    %c0_i32 = arith.constant 0 : i32
    %c0_i32_0 = arith.constant 0 : i32
    return %arg0, %c0_i32 : i32, i32
  }
  func.func @transform_1(%arg0: i32) -> (i32, i32) {
    %c0_i32 = arith.constant 0 : i32
    %c0_i32_0 = arith.constant 0 : i32
    %c0_i32_1 = arith.constant 0 : i32
    return %c0_i32, %c0_i32_0 : i32, i32
  }
  func.func @transform_2(%arg0: i32) -> (i32, i32) {
    %c0_i32 = arith.constant 0 : i32
    %c0_i32_0 = arith.constant 0 : i32
    %c0_i32_1 = arith.constant 0 : i32
    return %c0_i32, %c0_i32_0 : i32, i32
  }
  func.func @transform_3(%arg0: i32) -> (i32, i32) {
    %c0_i32 = arith.constant 0 : i32
    %c0_i32_0 = arith.constant 0 : i32
    %c0_i32_1 = arith.constant 0 : i32
    return %c0_i32, %c0_i32_0 : i32, i32
  }
  func.func @transform_4(%arg0: i32) -> (i32, i32) {
    %c0_i32 = arith.constant 0 : i32
    %c0_i32_0 = arith.constant 0 : i32
    %c0_i32_1 = arith.constant 0 : i32
    return %c0_i32, %c0_i32_0 : i32, i32
  }
  func.func @transform_5(%arg0: i32) -> (i32, i32) {
    %c0_i32 = arith.constant 0 : i32
    %c0_i32_0 = arith.constant 0 : i32
    %c0_i32_1 = arith.constant 0 : i32
    return %c0_i32, %c0_i32_0 : i32, i32
  }
  func.func @transform_6(%arg0: i32) -> (i32, i32) {
    %c0_i32 = arith.constant 0 : i32
    %c0_i32_0 = arith.constant 0 : i32
    %c0_i32_1 = arith.constant 0 : i32
    return %c0_i32, %c0_i32_0 : i32, i32
  }
  func.func @transform_7(%arg0: i32) -> (i32, i32) {
    %c0_i32 = arith.constant 0 : i32
    %c0_i32_0 = arith.constant 0 : i32
    return %arg0, %c0_i32 : i32, i32
  }
}

</mosaic_0001>

<bundles_post_ra>
// kernel: tpu_custom_call.1
= control target key start
LH: loop header
LB: loop body
LE: loop exit
PB: predicated region body
PF: predicated region fallthrough
CT: control target
= control target key end

     0   :  { %12 = vsyncpa [#allocation3], 0  ;;  %s1535_s0 = inlined_call_operand.hbm [shape: f32[64,256], index: 0, kind: input, shape index: {}]   ;;  %s1536_s1 = inlined_call_operand.hbm [shape: bf16[256,128], index: 1, kind: input, shape index: {}]   ;;  %s1537_s2 = inlined_call_operand.vmem [shape: f32[1,128], index: 2, kind: input, shape index: {}]   ;;  %s1538_s3 = inlined_call_operand.vmem [shape: bf16[128,128], index: 3, kind: input, shape index: {}]   ;;  %s1539_s4 = inlined_call_operand.vmem [shape: f32[1,128], index: 4, kind: input, shape index: {}]   ;;  %s1540_s5 = inlined_call_operand.vmem [shape: bf16[128,4], index: 5, kind: input, shape index: {}]   ;;  %s1541_s6 = inlined_call_operand.vmem [shape: f32[1,4], index: 6, kind: input, shape index: {}]   ;;  %s1542_s7 = inlined_call_operand.vmem [shape: f32[64,4], index: 7, kind: output, shape index: {}]  }
   0x1   :  { %14 = vsyncpa [#allocation3 + $0x1], 0 }
   0x2   :  { %15 = vsyncpa [#allocation5], 0  ;;  %s1339_s24 = smov 0   ;;  %s1341_s25 = smov 0  }
   0x3   :  { %s1343_s26 = smov 0   ;;  %s1345_s27 = smov 0  }
   0x4 LB: > { %s912_s28 = sadd.s32 4294967295, %s1291_s27   ;;  %p41_p0 = scmp.ne.s32.totalorder %s1283_s25, %s1279_s24  ;;  %s1291_s27 = sphi %s1345_s27, %s1558_s27   ;;  %s1287_s26 = sphi %s1343_s26, %s1557_s26   ;;  %s1283_s25 = sphi %s1341_s25, %s1556_s25   ;;  %s1279_s24 = sphi %s1339_s24, %s1555_s24  }
   0x5   : > { %p1361_p1 = scmp.eq.s32.totalorder %s912_s28, 0  ;;  %p914_p2 = scmp.ge.s32.totalorder %s1291_s27, 1 }
   0x6   : > { %p204_p3 = scmp.lt.s32.totalorder %s1291_s27, 3  ;;  %s1293_s9 = smov [#allocation4]  }
   0x7   : > { %s1547_s29 = scalar_select %p1361_p1, 1, 0 }
   0x8   : > { %p1369_p4 = por %p1361_p1, %p41_p0  ;;  %p1373_p5 = pnand %p914_p2, %p204_p3 }
   0x9   : > { %s216_s10 = sshll.u32 %s1293_s9, 4  ;;  %s1386_s12 = sadd.s32 1, %s1291_s27   ;;  %s217_s10 = int_to_ptr.vmem [resolvable:$true] %s216_s10 }
   0xa   : > { %s1548_s30 = scalar_select %p1369_p4, 1, 0 }
   0xb   : > { %s1549_s8 = scalar_select %p1373_p5, 1, 0 }
   0xc   : > { %p1071_p6 = pneg %p1373_p5  ;;  %s28_s13 = sadd.s32 1, %s1287_s26 }
   0xd   : > { %s25_s14 = ssub.s32 %s1291_s27, %s1386_s12  ;;  %s1210_s15 = scalar_lea.vmem %s217_s10, 2048 }
   0xe   : > { %p1381_p7 = pnand %p1071_p6, %p1361_p1  ;;  %p1211_p9 = scmp.ne.s32.totalorder %s217_s10, %s1210_s15 }
   0xf   : > { %p1218_p12 = scmp.lt.s32.totalorder %s217_s10, %s217_s10  ;;  %p1219_p13 = scmp.lt.s32.totalorder %s1210_s15, %s1210_s15 }
  0x10   : > { %p1201_p8 = pneg %p1381_p7 }
  0x11   : > { %p1220_p0 = por %p1219_p13, %p1218_p12 }
  0x12   : > { %p1213_p10 = pnand %p1211_p9, %p1201_p8 }
  0x14   : > { %p1214_p11 = pneg %p1213_p10 }
  0x16   : > { %p1221_p2 = pnand %p1220_p0, %p1214_p11 }
  0x18   : > { %1224 = shalt.err (!%p1221_p2)
}
  0x19   : > { %s1294_s16 = smov 64   ;;  %s1295_s17 = smov 4  }
  0x1a   : > { %1074 = dma.hbm_to_vmem [thread:$0]  (!%p1381_p7), %s1536_s1, 2048, %s217_s10, [#allocation5], %s1294_s16, %s1294_s16, %s1295_s17  }
  0x1b   : > { %p26_p3 = scmp.eq.s32.totalorder %s25_s14, 0  ;;  %p35_p6 = scmp.ne.s32.totalorder %s1287_s26, %s1283_s25 }
  0x1c   : > { %p36_p8 = scmp.eq.s32.totalorder %s1291_s27, 0  ;;  %p1080_p9 = scmp.lt.s32.totalorder %s1291_s27, 2 }
  0x1d   : > { %s1403_s20 = scalar_select %p26_p3, %s1287_s26, %s28_s13  }
  0x1e   : > { %p37_p10 = por %p36_p8, %p35_p6  ;;  %s245_s21 = sand.u32 1, %s1287_s26  }
  0x1f   : > { %s917_s22 = sshll.u32 %s245_s21, 6  ;;  %s976_s23 = sshll.u32 %s1291_s27, 10 }
  0x20   : > { %s1410_s15 = scalar_lea.hbm %s1535_s0, %s976_s23  ;;  %s249_s11 = scalar_lea.vmem [#allocation2], %s917_s22 }
  0x21   : > { %s257_s10 = sshll.u32 %s249_s11, 4  ;;  %p1414_p7 = pnand %p1080_p9, %p37_p10  ;;  %s1412_s10 = int_to_ptr.vmem [resolvable:$true] %s257_s10 }
  0x22   : > { %s1418_s13 = scalar_lea.sflag [#allocation3], %s245_s21  ;;  %s1225_s16 = scalar_lea.hbm %s1410_s15, 1024 }
  0x23   : > { %p1226_p11 = scmp.ne.s32.totalorder %s1410_s15, %s1225_s16  ;;  %p1227_p12 = pneg %p1414_p7 }
  0x24   : > { %s1230_s19 = scalar_lea.hbm %s1535_s0, 2048  ;;  %p1231_p2 = scmp.lt.s32.totalorder %s1410_s15, %s1535_s0 }
  0x25   : > { %p1228_p13 = pnand %p1227_p12, %p1226_p11  ;;  %p1232_p3 = scmp.lt.s32.totalorder %s1230_s19, %s1225_s16 }
  0x27   : > { %p1229_p0 = pneg %p1228_p13  ;;  %p1233_p6 = por %p1232_p3, %p1231_p2 }
  0x29   : > { %p1234_p8 = pnand %p1233_p6, %p1229_p0 }
  0x2b   : > { %1237 = shalt.err (!%p1234_p8)
}
  0x2c   : > { %s1238_s21 = scalar_lea.vmem %s1412_s10, 1024  ;;  %s1296_s24 = smov [#allocation2]  }
  0x2d   : > { %p1239_p9 = scmp.ne.s32.totalorder %s1412_s10, %s1238_s21  ;;  %s1243_s9 = sshll.u32 %s1296_s24, 4  ;;  %s1244_s9 = int_to_ptr.vmem [resolvable:$false] %s1243_s9 }
  0x2e   : > { %s1245_s11 = scalar_lea.vmem %s1244_s9, 2048  ;;  %p1246_p13 = scmp.lt.s32.totalorder %s1412_s10, %s1244_s9 }
  0x2f   : > { %p1241_p10 = pnand %p1239_p9, %p1227_p12  ;;  %p1247_p1 = scmp.lt.s32.totalorder %s1245_s11, %s1238_s21 }
  0x31   : > { %p1242_p11 = pneg %p1241_p10  ;;  %p1248_p4 = por %p1247_p1, %p1246_p13 }
  0x33   : > { %p1249_p5 = pnand %p1248_p4, %p1242_p11 }
  0x35   : > { %1252 = shalt.err (!%p1249_p5)
}
  0x36   : > { %s1297_s16 = smov 256   ;;  %s1298_s17 = smov 16  }
  0x37   : > { %1078 = dma.hbm_to_vmem [thread:$0]  (!%p1414_p7), %s1410_s15, 1024, %s1412_s10, %s1418_s13, %s1297_s16, %s1297_s16, %s1298_s17  }
  0x38   : > { %p1552_p12 = scmp.ne.s32.totalorder %s1549_s8, 0 }
  0x39   : > { %s271_s18 = sand.u32 (!%p1552_p12), 1, %s1283_s25   ;;  %p1553_p1 = scmp.ne.s32.totalorder (!%p1552_p12), %s1548_s30, 0 }
  0x3a   : > { %269 = sbr.rel (%p1552_p12) target bundleno = 817 (0x331), region = 48  ;;  %s922_s19 = sshll.u32 (!%p1552_p12), %s271_s18, 6 }
  0x3b   : > { %s272_s22 = scalar_lea.sflag (!%p1552_p12), [#allocation3], %s271_s18  ;;  %s1442_s23 = scalar_lea.vmem (!%p1552_p12), [#allocation2], %s922_s19 }
  0x3f   : > { %1270 = dma.done.wait (%p1553_p1), %s272_s22, 1024  }
  0x40   : > { %1272 = vsyncadd (%p1553_p1), %s272_s22, 4294966272  ;;  %p1554_p4 = scmp.ne.s32.totalorder %s1547_s29, 0 }
  0x42   : > { %1274 = dma.done.wait (%p1554_p4), [#allocation5], 2048  }
  0x43   : > { %1276 = vsyncadd (%p1554_p4), [#allocation5], 4294965248  ;;  %v1119_v0 = vld [vmem:[#allocation4 + $0x78] sm:$0xff]   ;;  %v1121_v2 = vld [vmem:[#allocation4 + $0x70] sm:$0xff]   ;;  %s924_s10 = sshll.u32 %s912_s28, 2  ;;  %vm830_vm0 = vcmask 31744  }
  0x44   : > { %v1120_v1 = vld [vmem:[#allocation4 + $0x38] sm:$0xff]   ;;  %977 = vmatprep.subr.bf16.mxu0 %v1119_v0  ;;  %v1122_v3 = vld [vmem:[#allocation4 + $0x30] sm:$0xff]   ;;  %v1123_v4 = vld [vmem:[#allocation4 + $0x68] sm:$0xff]   ;;  %p312_p5 = scmp.lt.s32.totalorder %s924_s10, 7 }
  0x45   : > { %978 = vmatpush3.bf16.msra.mxu0 %v1120_v1  ;;  %v1124_v5 = vld [vmem:[#allocation4 + $0x28] sm:$0xff]   ;;  %v1125_v6 = vld [vmem:[#allocation4 + $0x60] sm:$0xff]   ;;  %v1127_v8 = vld [vmem:[#allocation4 + $0x58] sm:$0xff]  }
  0x46   : > { %979 = vmatprep.subr.bf16.mxu0 %v1121_v2  ;;  %v1126_v7 = vld [vmem:[#allocation4 + $0x20] sm:$0xff]   ;;  %v1128_v9 = vld [vmem:[#allocation4 + $0x18] sm:$0xff]   ;;  %v1129_v10 = vld [vmem:[#allocation4 + $0x50] sm:$0xff]   ;;  %s1560_s10 = smov (!%p312_p5, %s924_s10), 7 }
  0x47   : > { %v319_v11 = vld [vmem:[%s1442_s23 + $0x8] sm:$0xff]  ;;  %v321_v12 = vld [vmem:[%s1442_s23 + $0x18] sm:$0xff]  ;;  %v1130_v14 = vld [vmem:[#allocation4 + $0x10] sm:$0xff]   ;;  %s925_s14 = sshll.u32 %s1560_s10, 3 }
  0x48   : > { %v327_v13 = vpack.c.bf16 %v321_v12, %v319_v11  ;;  %v1131_v15 = vld [vmem:[#allocation4 + $0x48] sm:$0xff]   ;;  %v1133_v17 = vld [vmem:[#allocation4 + $0x40] sm:$0xff]   ;;  %v320_v20 = vld [vmem:[%s1442_s23 + $0x10] sm:$0xff]  ;;  %s315_s24 = scalar_lea.vmem %s1542_s7, %s925_s14 }
  0x49   : > { %980 = vmatpush3.bf16.msra.mxu0 %v1122_v3  ;;  %v1132_v16 = vld [vmem:[#allocation4 + $0x8] sm:$0xff]   ;;  %v1134_v18 = vld [vmem:[#allocation4] sm:$0xff]   ;;  %v325_v22 = vld [vmem:[%s1442_s23 + $0x38] sm:$0xff] }
  0x4a   : > { %981 = vmatprep.subr.bf16.mxu0 %v1123_v4  ;;  %497 = vmatprep.mubr.bf16.mxu0 %v327_v13  ;;  %v318_v19 = vld [vmem:[%s1442_s23] sm:$0xff]  ;;  %v323_v21 = vld [vmem:[%s1442_s23 + $0x28] sm:$0xff]  ;;  %v324_v26 = vld [vmem:[%s1442_s23 + $0x30] sm:$0xff] }
  0x4b   : > { %v326_v23 = vpack.c.bf16 %v320_v20, %v318_v19  ;;  %v329_v24 = vpack.c.bf16 %v325_v22, %v323_v21  ;;  %v322_v25 = vld [vmem:[%s1442_s23 + $0x20] sm:$0xff]  ;;  %v1135_v28 = vld [vmem:[%s1538_s3 + $0x38] sm:$0xff]   ;;  %v1136_v29 = vld [vmem:[%s1538_s3 + $0x30] sm:$0xff]  }
  0x4c   : > { %v328_v27 = vpack.c.bf16 %v324_v26, %v322_v25  ;;  %1025 = vmatprep.subr.bf16.mxu1 %v1135_v28  ;;  %v1137_v30 = vld [vmem:[%s1538_s3 + $0x28] sm:$0xff]   ;;  %v1138_v31 = vld [vmem:[%s1538_s3 + $0x20] sm:$0xff]   ;;  %v1139_v32 = vld [vmem:[%s1538_s3 + $0x18] sm:$0xff]  }
  0x4d   : > { %982 = vmatpush3.bf16.msra.mxu0 %v1124_v5  ;;  %1026 = vmatpush3.bf16.msra.mxu1 %v1135_v28  ;;  %v1140_v33 = vld [vmem:[%s1538_s3 + $0x10] sm:$0xff]   ;;  %v1141_v34 = vld [vmem:[%s1538_s3 + $0x8] sm:$0xff]   ;;  %v1142_v35 = vld [vmem:[%s1538_s3] sm:$0xff]  }
  0x4e   : > { %983 = vmatprep.subr.bf16.mxu0 %v1125_v6  ;;  %1027 = vmatprep.subr.bf16.mxu1 %v1136_v29  ;;  %v926_v37 = vld [vmem:[%s1537_s2] ss:$0 sm:$0xff]  ;;  %v1147_v11 = vld [vmem:[%s1540_s5 + $0x18] sm:$0xff]   ;;  %v1148_v12 = vld [vmem:[%s1540_s5 + $0x10] sm:$0xff]  }
  0x4f   : > { %v1149_v13 = vld [vmem:[%s1540_s5 + $0x8] sm:$0xff]  }
  0x51   : > { %984 = vmatpush3.bf16.msra.mxu0 %v1126_v7  ;;  %1028 = vmatpush3.bf16.msra.mxu1 %v1136_v29  ;;  %v1143_v7 = vld [vmem:[%s1540_s5 + $0x38] sm:$0xff]  }
  0x52   : > { %985 = vmatprep.subr.bf16.mxu0 %v1127_v8  ;;  %1029 = vmatprep.subr.bf16.mxu1 %v1137_v30  ;;  %v1144_v8 = vld [vmem:[%s1540_s5 + $0x30] sm:$0xff]  }
  0x55   : > { %986 = vmatpush3.bf16.msra.mxu0 %v1128_v9  ;;  %1030 = vmatpush3.bf16.msra.mxu1 %v1137_v30  ;;  %v1145_v9 = vld [vmem:[%s1540_s5 + $0x28] sm:$0xff]  }
  0x56   : > { %987 = vmatprep.subr.bf16.mxu0 %v1129_v10  ;;  %1031 = vmatprep.subr.bf16.mxu1 %v1138_v31  ;;  %v1146_v10 = vld [vmem:[%s1540_s5 + $0x20] sm:$0xff]  }
  0x59   : > { %988 = vmatpush3.bf16.msra.mxu0 %v1130_v14  ;;  %1032 = vmatpush3.bf16.msra.mxu1 %v1138_v31  ;;  %v1150_v14 = vld [vmem:[%s1540_s5] sm:$0xff]  }
  0x5a   : > { %989 = vmatprep.subr.bf16.mxu0 %v1131_v15  ;;  %1033 = vmatprep.subr.bf16.mxu1 %v1139_v32  ;;  %v947_v15 = vld [vmem:[%s1539_s4] ss:$0 sm:$0xff] }
  0x5d   : > { %990 = vmatpush3.bf16.msra.mxu0 %v1132_v16  ;;  %1034 = vmatpush3.bf16.msra.mxu1 %v1139_v32 }
  0x5e   : > { %991 = vmatprep.subr.bf16.mxu0 %v1133_v17  ;;  %1035 = vmatprep.subr.bf16.mxu1 %v1140_v33 }
  0x61   : > { %992 = vmatpush3.bf16.msra.mxu0 %v1134_v18  ;;  %1036 = vmatpush3.bf16.msra.mxu1 %v1140_v33 }
  0x62   : > { %1037 = vmatprep.subr.bf16.mxu1 %v1141_v34  ;;  %1045 = vmatprep.subr.bf16.mxu0 %v1143_v7 }
  0x64   : > { %498 = vmatmul.mubr.bf16.vlgmr.msra.gmra.mxu0 %v326_v23 }
  0x65   : > { %505 = vmatprep.mubr.bf16.mxu0 %v329_v24  ;;  %1038 = vmatpush3.bf16.msra.mxu1 %v1141_v34 }
  0x66   : > { %1039 = vmatprep.subr.bf16.mxu1 %v1142_v35  ;;  %1046 = vmatpush3.bf16.msra.mxu0 %v1143_v7 }
  0x67   : > { %1047 = vmatprep.subr.bf16.mxu0 %v1144_v8 }
  0x69   : > { %1040 = vmatpush3.bf16.msra.mxu1 %v1142_v35 }
  0x6a   : > { %1048 = vmatpush3.bf16.msra.mxu0 %v1144_v8 }
  0x6b   : > { %1049 = vmatprep.subr.bf16.mxu0 %v1145_v9 }
  0x6c   : > { %506 = vmatmul.mubr.bf16.gmra.mxu0 %v328_v27 }
  0x6e   : > { %1050 = vmatpush3.bf16.msra.mxu0 %v1145_v9 }
  0x6f   : > { %1051 = vmatprep.subr.bf16.mxu0 %v1146_v10 }
  0x72   : > { %1052 = vmatpush3.bf16.msra.mxu0 %v1146_v10 }
  0x73   : > { %1053 = vmatprep.subr.bf16.mxu0 %v1147_v11 }
  0x76   : > { %1054 = vmatpush3.bf16.msra.mxu0 %v1147_v11 }
  0x77   : > { %1055 = vmatprep.subr.bf16.mxu0 %v1148_v12 }
  0x7a   : > { %1056 = vmatpush3.bf16.msra.mxu0 %v1148_v12 }
  0x7b   : > { %1057 = vmatprep.subr.bf16.mxu0 %v1149_v13 }
  0x7e   : > { %1058 = vmatpush3.bf16.msra.mxu0 %v1149_v13 }
  0x7f   : > { %1059 = vmatprep.subr.bf16.mxu0 %v1150_v14 }
  0x82   : > { %1060 = vmatpush3.bf16.msra.mxu0 %v1150_v14 }
 0x124   : > { %v993_v36 = vpop.f32.mrf.mxu0 }
 0x126   : > { %v994_v38 = vpop.f32.mrf.mxu0 }
 0x127   : > { %v995_v39 = vadd.f32 %v994_v38, %v993_v36 }
 0x128   : > { %v996_v40 = vpop.f32.mrf.mxu0 }
 0x129   : > { %v500_v41 = vadd.f32 %v995_v39, %v926_v37 }
 0x12a   : > { %v997_v42 = vpop.f32.mrf.mxu0 }
 0x12b   : > { %v943_v43 = vmul.f32 -1.442695, %v500_v41  ;;  %v998_v44 = vadd.f32 %v997_v42, %v996_v40  ;;  %v960_v42 = vld [vmem:[%s1541_s6] ss:$0 sm:$0xff] }
 0x12c   : > { %v999_v45 = vpop.f32.mrf.mxu0 }
 0x12d   : > { %1151 = vpow2.f32 %v943_v43  ;;  %v503_v46 = vadd.f32 %v998_v44, %v926_v37 }
 0x12e   : > { %v1000_v47 = vpop.f32.mrf.mxu0 }
 0x12f   : > { %v944_v48 = vmul.f32 -1.442695, %v503_v46  ;;  %v1001_v49 = vadd.f32 %v1000_v47, %v999_v45 }
 0x130   : > { %v1002_v50 = vpop.f32.mrf.mxu0 }
 0x131   : > { %1153 = vpow2.f32 %v944_v48  ;;  %v508_v51 = vadd.f32 %v1001_v49, %v926_v37 }
 0x132   : > { %v1003_v52 = vpop.f32.mrf.mxu0 }
 0x133   : > { %v945_v53 = vmul.f32 -1.442695, %v508_v51  ;;  %v1004_v54 = vadd.f32 %v1003_v52, %v1002_v50 }
 0x135   : > { %1155 = vpow2.f32 %v945_v53  ;;  %v511_v55 = vadd.f32 %v1004_v54, %v926_v37 }
 0x137   : > { %v946_v56 = vmul.f32 -1.442695, %v511_v55 }
 0x139   : > { %1157 = vpow2.f32 %v946_v56 }
 0x13a   : > { %v1152_v57 = vpop.eup %1151 }
 0x13b   : > { %v526_v58 = vadd.f32 1.0, %v1152_v57 }
 0x13d   : > { %1159 = vrcp.f32 %v526_v58 }
 0x13e   : > { %v1154_v59 = vpop.eup %1153 }
 0x13f   : > { %v527_v60 = vadd.f32 1.0, %v1154_v59 }
 0x141   : > { %1161 = vrcp.f32 %v527_v60 }
 0x142   : > { %v1156_v61 = vpop.eup %1155 }
 0x143   : > { %v528_v62 = vadd.f32 1.0, %v1156_v61 }
 0x145   : > { %1163 = vrcp.f32 %v528_v62 }
 0x146   : > { %v1158_v63 = vpop.eup %1157 }
 0x147   : > { %v529_v0 = vadd.f32 1.0, %v1158_v63 }
 0x149   : > { %1165 = vrcp.f32 %v529_v0 }
 0x14a   : > { %v1160_v1 = vpop.eup %1159 }
 0x14e   : > { %v1162_v2 = vpop.eup %1161 }
 0x14f   : > { %v538_v3 = vpack.c.bf16 %v1162_v2, %v1160_v1 }
 0x151   : > { %1041 = vmatprep.mubr.bf16.mxu1 %v538_v3 }
 0x152   : > { %v1164_v4 = vpop.eup %1163 }
 0x156   : > { %v1166_v5 = vpop.eup %1165 }
 0x157   : > { %v539_v6 = vpack.c.bf16 %v1166_v5, %v1164_v4 }
 0x159   : > { %1042 = vmatmul.mubr.bf16.vlgmr.msra.gmra.mxu1 %v539_v6 }
 0x219   : > { %v1043_v16 = vpop.f32.mrf.mxu1 }
 0x21a   : > { %v654_v17 = vadd.f32 %v1043_v16, %v947_v15 }
 0x21b   : > { %v645_v18 = vpop.f32.mrf.mxu1 }
 0x21c   : > { %v646_v19 = vadd.f32 %v947_v15, %v645_v18  ;;  %v958_v20 = vmul.f32 -1.442695, %v654_v17 }
 0x21d   : > { %v1044_v21 = vpop.f32.mrf.mxu1 }
 0x21e   : > { %v956_v22 = vmul.f32 -1.442695, %v646_v19  ;;  %v657_v23 = vadd.f32 %v1044_v21, %v947_v15 }
 0x21f   : > { %v648_v24 = vpop.f32.mrf.mxu1 }
 0x220   : > { %1167 = vpow2.f32 %v956_v22  ;;  %v959_v25 = vmul.f32 -1.442695, %v657_v23  ;;  %v649_v26 = vadd.f32 %v947_v15, %v648_v24 }
 0x221   : > { %1169 = vpow2.f32 %v958_v20 }
 0x222   : > { %1171 = vpow2.f32 %v959_v25  ;;  %v957_v27 = vmul.f32 -1.442695, %v649_v26 }
 0x224   : > { %1173 = vpow2.f32 %v957_v27 }
 0x22d   : > { %v1168_v28 = vpop.eup %1167 }
 0x22e   : > { %v1170_v29 = vpop.eup %1169  ;;  %v672_v30 = vadd.f32 1.0, %v1168_v28 }
 0x22f   : > { %v1172_v31 = vpop.eup %1171  ;;  %v674_v34 = vadd.f32 1.0, %v1170_v29 }
 0x230   : > { %v675_v32 = vadd.f32 1.0, %v1172_v31  ;;  %1175 = vrcp.f32 %v672_v30 }
 0x231   : > { %v1174_v33 = vpop.eup %1173 }
 0x232   : > { %v673_v35 = vadd.f32 1.0, %v1174_v33  ;;  %1177 = vrcp.f32 %v675_v32 }
 0x234   : > { %1179 = vrcp.f32 %v673_v35 }
 0x235   : > { %1181 = vrcp.f32 %v674_v34 }
 0x23d   : > { %v1176_v36 = vpop.eup %1175 }
 0x23f   : > { %v1178_v37 = vpop.eup %1177 }
 0x241   : > { %v1180_v38 = vpop.eup %1179 }
 0x242   : > { %v1182_v39 = vpop.eup %1181  ;;  %v684_v40 = vpack.c.bf16 %v1180_v38, %v1176_v36 }
 0x243   : > { %v685_v41 = vpack.c.bf16 %v1178_v37, %v1182_v39 }
 0x244   : > { %1061 = vmatprep.mubr.bf16.mxu0 %v684_v40 }
 0x245   : > { %1062 = vmatmul.mubr.bf16.vlgmr.msra.gmra.mxu0 %v685_v41 }
 0x305   : > { %v1063_v43 = vpop.f32.mrf.mxu0 }
 0x306   : > { %v800_v44 = vadd.f32 %v1063_v43, %v960_v42 }
 0x307   : > { %v791_v45 = vpop.f32.mrf.mxu0 }
 0x308   : > { %v792_v46 = vadd.f32 %v960_v42, %v791_v45  ;;  %v971_v47 = vmul.f32 -1.442695, %v800_v44 }
 0x309   : > { %v1064_v48 = vpop.f32.mrf.mxu0 }
 0x30a   : > { %v969_v49 = vmul.f32 -1.442695, %v792_v46  ;;  %v803_v50 = vadd.f32 %v1064_v48, %v960_v42 }
 0x30b   : > { %v794_v51 = vpop.f32.mrf.mxu0 }
 0x30c   : > { %1183 = vpow2.f32 %v969_v49  ;;  %v972_v52 = vmul.f32 -1.442695, %v803_v50  ;;  %v795_v53 = vadd.f32 %v960_v42, %v794_v51 }
 0x30d   : > { %1185 = vpow2.f32 %v971_v47 }
 0x30e   : > { %1187 = vpow2.f32 %v972_v52  ;;  %v970_v54 = vmul.f32 -1.442695, %v795_v53 }
 0x310   : > { %1189 = vpow2.f32 %v970_v54 }
 0x319   : > { %v1184_v55 = vpop.eup %1183 }
 0x31a   : > { %v1186_v56 = vpop.eup %1185  ;;  %v818_v57 = vadd.f32 1.0, %v1184_v55 }
 0x31b   : > { %v1188_v58 = vpop.eup %1187  ;;  %v820_v60 = vadd.f32 1.0, %v1186_v56 }
 0x31c   : > { %1191 = vrcp.f32 %v818_v57  ;;  %v821_v61 = vadd.f32 1.0, %v1188_v58 }
 0x31d   : > { %v1190_v59 = vpop.eup %1189 }
 0x31e   : > { %v819_v62 = vadd.f32 1.0, %v1190_v59 }
 0x320   : > { %1193 = vrcp.f32 %v819_v62 }
 0x321   : > { %1195 = vrcp.f32 %v820_v60 }
 0x322   : > { %1197 = vrcp.f32 %v821_v61 }
 0x329   : > { %v1192_v63 = vpop.eup %1191 }
 0x32a   : > { %831 = vst.msk [vmem:[%s315_s24] sm:$0xff] %vm830_vm0, %v1192_v63 }
 0x32d   : > { %v1194_v0 = vpop.eup %1193 }
 0x32e   : > { %v1196_v1 = vpop.eup %1195  ;;  %832 = vst.msk [vmem:[%s315_s24 + $0x8] sm:$0xff] %vm830_vm0, %v1194_v0 }
 0x32f   : > { %v1198_v2 = vpop.eup %1197  ;;  %833 = vst.msk [vmem:[%s315_s24 + $0x10] sm:$0xff] %vm830_vm0, %v1196_v1 }
 0x330   : > { %834 = vst.msk [vmem:[%s315_s24 + $0x18] sm:$0xff] %vm830_vm0, %v1198_v2 }
 0x331 PF: > { %p18_p7 = scmp.ge.s32.totalorder %s1386_s12, 4   ;;  %s1555_s24 = smov %s1283_s25 }
 0x332   : > { %s1556_s25 = smov %s1287_s26  ;;  %s1557_s26 = smov %s1403_s20 }
 0x333   : > { %s1558_s27 = smov %s1386_s12  ;;  %20 = sbr.rel (!%p18_p7) target bundleno = 4 (0x4), region = 92 }
 0x338   :  { %857 = vsyncpa [#allocation3], 1 }
 0x339   :  { %859 = vsyncpa [#allocation3 + $0x1], 1 }
 0x33a   :  { %860 = vsyncpa [#allocation5], 1 }

// kernel: tpu_custom_call.1
= control target key start
LH: loop header
LB: loop body
LE: loop exit
PB: predicated region body
PF: predicated region fallthrough
CT: control target
= control target key end

     0   :  { %12 = vsyncpa [#allocation3], 0  ;;  %s1535_s0 = inlined_call_operand.hbm [shape: f32[64,256], index: 0, kind: input, shape index: {}]   ;;  %s1536_s1 = inlined_call_operand.hbm [shape: bf16[256,128], index: 1, kind: input, shape index: {}]   ;;  %s1537_s2 = inlined_call_operand.vmem [shape: f32[1,128], index: 2, kind: input, shape index: {}]   ;;  %s1538_s3 = inlined_call_operand.vmem [shape: bf16[128,128], index: 3, kind: input, shape index: {}]   ;;  %s1539_s4 = inlined_call_operand.vmem [shape: f32[1,128], index: 4, kind: input, shape index: {}]   ;;  %s1540_s5 = inlined_call_operand.vmem [shape: bf16[128,4], index: 5, kind: input, shape index: {}]   ;;  %s1541_s6 = inlined_call_operand.vmem [shape: f32[1,4], index: 6, kind: input, shape index: {}]   ;;  %s1542_s7 = inlined_call_operand.vmem [shape: f32[64,4], index: 7, kind: output, shape index: {}]  }
   0x1   :  { %14 = vsyncpa [#allocation3 + $0x1], 0 }
   0x2   :  { %15 = vsyncpa [#allocation5], 0  ;;  %s1339_s24 = smov 0   ;;  %s1341_s25 = smov 0  }
   0x3   :  { %s1343_s26 = smov 0   ;;  %s1345_s27 = smov 0  }
   0x4 LB: > { %s912_s28 = sadd.s32 4294967295, %s1291_s27   ;;  %p41_p0 = scmp.ne.s32.totalorder %s1283_s25, %s1279_s24  ;;  %s1291_s27 = sphi %s1345_s27, %s1558_s27   ;;  %s1287_s26 = sphi %s1343_s26, %s1557_s26   ;;  %s1283_s25 = sphi %s1341_s25, %s1556_s25   ;;  %s1279_s24 = sphi %s1339_s24, %s1555_s24  }
   0x5   : > { %p1361_p1 = scmp.eq.s32.totalorder %s912_s28, 0  ;;  %p914_p2 = scmp.ge.s32.totalorder %s1291_s27, 1 }
   0x6   : > { %p204_p3 = scmp.lt.s32.totalorder %s1291_s27, 3  ;;  %s1293_s9 = smov [#allocation4]  }
   0x7   : > { %s1547_s29 = scalar_select %p1361_p1, 1, 0 }
   0x8   : > { %p1369_p4 = por %p1361_p1, %p41_p0  ;;  %p1373_p5 = pnand %p914_p2, %p204_p3 }
   0x9   : > { %s216_s10 = sshll.u32 %s1293_s9, 4  ;;  %s1386_s12 = sadd.s32 1, %s1291_s27   ;;  %s217_s10 = int_to_ptr.vmem [resolvable:$true] %s216_s10 }
   0xa   : > { %s1548_s30 = scalar_select %p1369_p4, 1, 0 }
   0xb   : > { %s1549_s8 = scalar_select %p1373_p5, 1, 0 }
   0xc   : > { %p1071_p6 = pneg %p1373_p5  ;;  %s28_s13 = sadd.s32 1, %s1287_s26 }
   0xd   : > { %s25_s14 = ssub.s32 %s1291_s27, %s1386_s12  ;;  %s1210_s15 = scalar_lea.vmem %s217_s10, 2048 }
   0xe   : > { %p1381_p7 = pnand %p1071_p6, %p1361_p1  ;;  %p1211_p9 = scmp.ne.s32.totalorder %s217_s10, %s1210_s15 }
   0xf   : > { %p1218_p12 = scmp.lt.s32.totalorder %s217_s10, %s217_s10  ;;  %p1219_p13 = scmp.lt.s32.totalorder %s1210_s15, %s1210_s15 }
  0x10   : > { %p1201_p8 = pneg %p1381_p7 }
  0x11   : > { %p1220_p0 = por %p1219_p13, %p1218_p12 }
  0x12   : > { %p1213_p10 = pnand %p1211_p9, %p1201_p8 }
  0x14   : > { %p1214_p11 = pneg %p1213_p10 }
  0x16   : > { %p1221_p2 = pnand %p1220_p0, %p1214_p11 }
  0x18   : > { %1224 = shalt.err (!%p1221_p2)
}
  0x19   : > { %s1294_s16 = smov 64   ;;  %s1295_s17 = smov 4  }
  0x1a   : > { %1074 = dma.hbm_to_vmem [thread:$0]  (!%p1381_p7), %s1536_s1, 2048, %s217_s10, [#allocation5], %s1294_s16, %s1294_s16, %s1295_s17  }
  0x1b   : > { %p26_p3 = scmp.eq.s32.totalorder %s25_s14, 0  ;;  %p35_p6 = scmp.ne.s32.totalorder %s1287_s26, %s1283_s25 }
  0x1c   : > { %p36_p8 = scmp.eq.s32.totalorder %s1291_s27, 0  ;;  %p1080_p9 = scmp.lt.s32.totalorder %s1291_s27, 2 }
  0x1d   : > { %s1403_s20 = scalar_select %p26_p3, %s1287_s26, %s28_s13  }
  0x1e   : > { %p37_p10 = por %p36_p8, %p35_p6  ;;  %s245_s21 = sand.u32 1, %s1287_s26  }
  0x1f   : > { %s917_s22 = sshll.u32 %s245_s21, 6  ;;  %s976_s23 = sshll.u32 %s1291_s27, 10 }
  0x20   : > { %s1410_s15 = scalar_lea.hbm %s1535_s0, %s976_s23  ;;  %s249_s11 = scalar_lea.vmem [#allocation2], %s917_s22 }
  0x21   : > { %s257_s10 = sshll.u32 %s249_s11, 4  ;;  %p1414_p7 = pnand %p1080_p9, %p37_p10  ;;  %s1412_s10 = int_to_ptr.vmem [resolvable:$true] %s257_s10 }
  0x22   : > { %s1418_s13 = scalar_lea.sflag [#allocation3], %s245_s21  ;;  %s1225_s16 = scalar_lea.hbm %s1410_s15, 1024 }
  0x23   : > { %p1226_p11 = scmp.ne.s32.totalorder %s1410_s15, %s1225_s16  ;;  %p1227_p12 = pneg %p1414_p7 }
  0x24   : > { %s1230_s19 = scalar_lea.hbm %s1535_s0, 2048  ;;  %p1231_p2 = scmp.lt.s32.totalorder %s1410_s15, %s1535_s0 }
  0x25   : > { %p1228_p13 = pnand %p1227_p12, %p1226_p11  ;;  %p1232_p3 = scmp.lt.s32.totalorder %s1230_s19, %s1225_s16 }
  0x27   : > { %p1229_p0 = pneg %p1228_p13  ;;  %p1233_p6 = por %p1232_p3, %p1231_p2 }
  0x29   : > { %p1234_p8 = pnand %p1233_p6, %p1229_p0 }
  0x2b   : > { %1237 = shalt.err (!%p1234_p8)
}
  0x2c   : > { %s1238_s21 = scalar_lea.vmem %s1412_s10, 1024  ;;  %s1296_s24 = smov [#allocation2]  }
  0x2d   : > { %p1239_p9 = scmp.ne.s32.totalorder %s1412_s10, %s1238_s21  ;;  %s1243_s9 = sshll.u32 %s1296_s24, 4  ;;  %s1244_s9 = int_to_ptr.vmem [resolvable:$false] %s1243_s9 }
  0x2e   : > { %s1245_s11 = scalar_lea.vmem %s1244_s9, 2048  ;;  %p1246_p13 = scmp.lt.s32.totalorder %s1412_s10, %s1244_s9 }
  0x2f   : > { %p1241_p10 = pnand %p1239_p9, %p1227_p12  ;;  %p1247_p1 = scmp.lt.s32.totalorder %s1245_s11, %s1238_s21 }
  0x31   : > { %p1242_p11 = pneg %p1241_p10  ;;  %p1248_p4 = por %p1247_p1, %p1246_p13 }
  0x33   : > { %p1249_p5 = pnand %p1248_p4, %p1242_p11 }
  0x35   : > { %1252 = shalt.err (!%p1249_p5)
}
  0x36   : > { %s1297_s16 = smov 256   ;;  %s1298_s17 = smov 16  }
  0x37   : > { %1078 = dma.hbm_to_vmem [thread:$0]  (!%p1414_p7), %s1410_s15, 1024, %s1412_s10, %s1418_s13, %s1297_s16, %s1297_s16, %s1298_s17  }
  0x38   : > { %p1552_p12 = scmp.ne.s32.totalorder %s1549_s8, 0 }
  0x39   : > { %s271_s18 = sand.u32 (!%p1552_p12), 1, %s1283_s25   ;;  %p1553_p1 = scmp.ne.s32.totalorder (!%p1552_p12), %s1548_s30, 0 }
  0x3a   : > { %269 = sbr.rel (%p1552_p12) target bundleno = 817 (0x331), region = 48  ;;  %s922_s19 = sshll.u32 (!%p1552_p12), %s271_s18, 6 }
  0x3b   : > { %s272_s22 = scalar_lea.sflag (!%p1552_p12), [#allocation3], %s271_s18  ;;  %s1442_s23 = scalar_lea.vmem (!%p1552_p12), [#allocation2], %s922_s19 }
  0x3f   : > { %1270 = dma.done.wait (%p1553_p1), %s272_s22, 1024  }
  0x40   : > { %1272 = vsyncadd (%p1553_p1), %s272_s22, 4294966272  ;;  %p1554_p4 = scmp.ne.s32.totalorder %s1547_s29, 0 }
  0x42   : > { %1274 = dma.done.wait (%p1554_p4), [#allocation5], 2048  }
  0x43   : > { %1276 = vsyncadd (%p1554_p4), [#allocation5], 4294965248  ;;  %v1119_v0 = vld [vmem:[#allocation4 + $0x78] sm:$0xff]   ;;  %v1121_v2 = vld [vmem:[#allocation4 + $0x70] sm:$0xff]   ;;  %s924_s10 = sshll.u32 %s912_s28, 2  ;;  %vm830_vm0 = vcmask 31744  }
  0x44   : > { %v1120_v1 = vld [vmem:[#allocation4 + $0x38] sm:$0xff]   ;;  %977 = vmatprep.subr.bf16.mxu0 %v1119_v0  ;;  %v1122_v3 = vld [vmem:[#allocation4 + $0x30] sm:$0xff]   ;;  %v1123_v4 = vld [vmem:[#allocation4 + $0x68] sm:$0xff]   ;;  %p312_p5 = scmp.lt.s32.totalorder %s924_s10, 7 }
  0x45   : > { %978 = vmatpush3.bf16.msra.mxu0 %v1120_v1  ;;  %v1124_v5 = vld [vmem:[#allocation4 + $0x28] sm:$0xff]   ;;  %v1125_v6 = vld [vmem:[#allocation4 + $0x60] sm:$0xff]   ;;  %v1127_v8 = vld [vmem:[#allocation4 + $0x58] sm:$0xff]  }
  0x46   : > { %979 = vmatprep.subr.bf16.mxu0 %v1121_v2  ;;  %v1126_v7 = vld [vmem:[#allocation4 + $0x20] sm:$0xff]   ;;  %v1128_v9 = vld [vmem:[#allocation4 + $0x18] sm:$0xff]   ;;  %v1129_v10 = vld [vmem:[#allocation4 + $0x50] sm:$0xff]   ;;  %s1560_s10 = smov (!%p312_p5, %s924_s10), 7 }
  0x47   : > { %v319_v11 = vld [vmem:[%s1442_s23 + $0x8] sm:$0xff]  ;;  %v321_v12 = vld [vmem:[%s1442_s23 + $0x18] sm:$0xff]  ;;  %v1130_v14 = vld [vmem:[#allocation4 + $0x10] sm:$0xff]   ;;  %s925_s14 = sshll.u32 %s1560_s10, 3 }
  0x48   : > { %v327_v13 = vpack.c.bf16 %v321_v12, %v319_v11  ;;  %v1131_v15 = vld [vmem:[#allocation4 + $0x48] sm:$0xff]   ;;  %v1133_v17 = vld [vmem:[#allocation4 + $0x40] sm:$0xff]   ;;  %v320_v20 = vld [vmem:[%s1442_s23 + $0x10] sm:$0xff]  ;;  %s315_s24 = scalar_lea.vmem %s1542_s7, %s925_s14 }
  0x49   : > { %980 = vmatpush3.bf16.msra.mxu0 %v1122_v3  ;;  %v1132_v16 = vld [vmem:[#allocation4 + $0x8] sm:$0xff]   ;;  %v1134_v18 = vld [vmem:[#allocation4] sm:$0xff]   ;;  %v325_v22 = vld [vmem:[%s1442_s23 + $0x38] sm:$0xff] }
  0x4a   : > { %981 = vmatprep.subr.bf16.mxu0 %v1123_v4  ;;  %497 = vmatprep.mubr.bf16.mxu0 %v327_v13  ;;  %v318_v19 = vld [vmem:[%s1442_s23] sm:$0xff]  ;;  %v323_v21 = vld [vmem:[%s1442_s23 + $0x28] sm:$0xff]  ;;  %v324_v26 = vld [vmem:[%s1442_s23 + $0x30] sm:$0xff] }
  0x4b   : > { %v326_v23 = vpack.c.bf16 %v320_v20, %v318_v19  ;;  %v329_v24 = vpack.c.bf16 %v325_v22, %v323_v21  ;;  %v322_v25 = vld [vmem:[%s1442_s23 + $0x20] sm:$0xff]  ;;  %v1135_v28 = vld [vmem:[%s1538_s3 + $0x38] sm:$0xff]   ;;  %v1136_v29 = vld [vmem:[%s1538_s3 + $0x30] sm:$0xff]  }
  0x4c   : > { %v328_v27 = vpack.c.bf16 %v324_v26, %v322_v25  ;;  %1025 = vmatprep.subr.bf16.mxu1 %v1135_v28  ;;  %v1137_v30 = vld [vmem:[%s1538_s3 + $0x28] sm:$0xff]   ;;  %v1138_v31 = vld [vmem:[%s1538_s3 + $0x20] sm:$0xff]   ;;  %v1139_v32 = vld [vmem:[%s1538_s3 + $0x18] sm:$0xff]  }
  0x4d   : > { %982 = vmatpush3.bf16.msra.mxu0 %v1124_v5  ;;  %1026 = vmatpush3.bf16.msra.mxu1 %v1135_v28  ;;  %v1140_v33 = vld [vmem:[%s1538_s3 + $0x10] sm:$0xff]   ;;  %v1141_v34 = vld [vmem:[%s1538_s3 + $0x8] sm:$0xff]   ;;  %v1142_v35 = vld [vmem:[%s1538_s3] sm:$0xff]  }
  0x4e   : > { %983 = vmatprep.subr.bf16.mxu0 %v1125_v6  ;;  %1027 = vmatprep.subr.bf16.mxu1 %v1136_v29  ;;  %v926_v37 = vld [vmem:[%s1537_s2] ss:$0 sm:$0xff]  ;;  %v1147_v11 = vld [vmem:[%s1540_s5 + $0x18] sm:$0xff]   ;;  %v1148_v12 = vld [vmem:[%s1540_s5 + $0x10] sm:$0xff]  }
  0x4f   : > { %v1149_v13 = vld [vmem:[%s1540_s5 + $0x8] sm:$0xff]  }
  0x51   : > { %984 = vmatpush3.bf16.msra.mxu0 %v1126_v7  ;;  %1028 = vmatpush3.bf16.msra.mxu1 %v1136_v29  ;;  %v1143_v7 = vld [vmem:[%s1540_s5 + $0x38] sm:$0xff]  }
  0x52   : > { %985 = vmatprep.subr.bf16.mxu0 %v1127_v8  ;;  %1029 = vmatprep.subr.bf16.mxu1 %v1137_v30  ;;  %v1144_v8 = vld [vmem:[%s1540_s5 + $0x30] sm:$0xff]  }
  0x55   : > { %986 = vmatpush3.bf16.msra.mxu0 %v1128_v9  ;;  %1030 = vmatpush3.bf16.msra.mxu1 %v1137_v30  ;;  %v1145_v9 = vld [vmem:[%s1540_s5 + $0x28] sm:$0xff]  }
  0x56   : > { %987 = vmatprep.subr.bf16.mxu0 %v1129_v10  ;;  %1031 = vmatprep.subr.bf16.mxu1 %v1138_v31  ;;  %v1146_v10 = vld [vmem:[%s1540_s5 + $0x20] sm:$0xff]  }
  0x59   : > { %988 = vmatpush3.bf16.msra.mxu0 %v1130_v14  ;;  %1032 = vmatpush3.bf16.msra.mxu1 %v1138_v31  ;;  %v1150_v14 = vld [vmem:[%s1540_s5] sm:$0xff]  }
  0x5a   : > { %989 = vmatprep.subr.bf16.mxu0 %v1131_v15  ;;  %1033 = vmatprep.subr.bf16.mxu1 %v1139_v32  ;;  %v947_v15 = vld [vmem:[%s1539_s4] ss:$0 sm:$0xff] }
  0x5d   : > { %990 = vmatpush3.bf16.msra.mxu0 %v1132_v16  ;;  %1034 = vmatpush3.bf16.msra.mxu1 %v1139_v32 }
  0x5e   : > { %991 = vmatprep.subr.bf16.mxu0 %v1133_v17  ;;  %1035 = vmatprep.subr.bf16.mxu1 %v1140_v33 }
  0x61   : > { %992 = vmatpush3.bf16.msra.mxu0 %v1134_v18  ;;  %1036 = vmatpush3.bf16.msra.mxu1 %v1140_v33 }
  0x62   : > { %1037 = vmatprep.subr.bf16.mxu1 %v1141_v34  ;;  %1045 = vmatprep.subr.bf16.mxu0 %v1143_v7 }
  0x64   : > { %498 = vmatmul.mubr.bf16.vlgmr.msra.gmra.mxu0 %v326_v23 }
  0x65   : > { %505 = vmatprep.mubr.bf16.mxu0 %v329_v24  ;;  %1038 = vmatpush3.bf16.msra.mxu1 %v1141_v34 }
  0x66   : > { %1039 = vmatprep.subr.bf16.mxu1 %v1142_v35  ;;  %1046 = vmatpush3.bf16.msra.mxu0 %v1143_v7 }
  0x67   : > { %1047 = vmatprep.subr.bf16.mxu0 %v1144_v8 }
  0x69   : > { %1040 = vmatpush3.bf16.msra.mxu1 %v1142_v35 }
  0x6a   : > { %1048 = vmatpush3.bf16.msra.mxu0 %v1144_v8 }
  0x6b   : > { %1049 = vmatprep.subr.bf16.mxu0 %v1145_v9 }
  0x6c   : > { %506 = vmatmul.mubr.bf16.gmra.mxu0 %v328_v27 }
  0x6e   : > { %1050 = vmatpush3.bf16.msra.mxu0 %v1145_v9 }
  0x6f   : > { %1051 = vmatprep.subr.bf16.mxu0 %v1146_v10 }
  0x72   : > { %1052 = vmatpush3.bf16.msra.mxu0 %v1146_v10 }
  0x73   : > { %1053 = vmatprep.subr.bf16.mxu0 %v1147_v11 }
  0x76   : > { %1054 = vmatpush3.bf16.msra.mxu0 %v1147_v11 }
  0x77   : > { %1055 = vmatprep.subr.bf16.mxu0 %v1148_v12 }
  0x7a   : > { %1056 = vmatpush3.bf16.msra.mxu0 %v1148_v12 }
  0x7b   : > { %1057 = vmatprep.subr.bf16.mxu0 %v1149_v13 }
  0x7e   : > { %1058 = vmatpush3.bf16.msra.mxu0 %v1149_v13 }
  0x7f   : > { %1059 = vmatprep.subr.bf16.mxu0 %v1150_v14 }
  0x82   : > { %1060 = vmatpush3.bf16.msra.mxu0 %v1150_v14 }
 0x124   : > { %v993_v36 = vpop.f32.mrf.mxu0 }
 0x126   : > { %v994_v38 = vpop.f32.mrf.mxu0 }
 0x127   : > { %v995_v39 = vadd.f32 %v994_v38, %v993_v36 }
 0x128   : > { %v996_v40 = vpop.f32.mrf.mxu0 }
 0x129   : > { %v500_v41 = vadd.f32 %v995_v39, %v926_v37 }
 0x12a   : > { %v997_v42 = vpop.f32.mrf.mxu0 }
 0x12b   : > { %v943_v43 = vmul.f32 -1.442695, %v500_v41  ;;  %v998_v44 = vadd.f32 %v997_v42, %v996_v40  ;;  %v960_v42 = vld [vmem:[%s1541_s6] ss:$0 sm:$0xff] }
 0x12c   : > { %v999_v45 = vpop.f32.mrf.mxu0 }
 0x12d   : > { %1151 = vpow2.f32 %v943_v43  ;;  %v503_v46 = vadd.f32 %v998_v44, %v926_v37 }
 0x12e   : > { %v1000_v47 = vpop.f32.mrf.mxu0 }
 0x12f   : > { %v944_v48 = vmul.f32 -1.442695, %v503_v46  ;;  %v1001_v49 = vadd.f32 %v1000_v47, %v999_v45 }
 0x130   : > { %v1002_v50 = vpop.f32.mrf.mxu0 }
 0x131   : > { %1153 = vpow2.f32 %v944_v48  ;;  %v508_v51 = vadd.f32 %v1001_v49, %v926_v37 }
 0x132   : > { %v1003_v52 = vpop.f32.mrf.mxu0 }
 0x133   : > { %v945_v53 = vmul.f32 -1.442695, %v508_v51  ;;  %v1004_v54 = vadd.f32 %v1003_v52, %v1002_v50 }
 0x135   : > { %1155 = vpow2.f32 %v945_v53  ;;  %v511_v55 = vadd.f32 %v1004_v54, %v926_v37 }
 0x137   : > { %v946_v56 = vmul.f32 -1.442695, %v511_v55 }
 0x139   : > { %1157 = vpow2.f32 %v946_v56 }
 0x13a   : > { %v1152_v57 = vpop.eup %1151 }
 0x13b   : > { %v526_v58 = vadd.f32 1.0, %v1152_v57 }
 0x13d   : > { %1159 = vrcp.f32 %v526_v58 }
 0x13e   : > { %v1154_v59 = vpop.eup %1153 }
 0x13f   : > { %v527_v60 = vadd.f32 1.0, %v1154_v59 }
 0x141   : > { %1161 = vrcp.f32 %v527_v60 }
 0x142   : > { %v1156_v61 = vpop.eup %1155 }
 0x143   : > { %v528_v62 = vadd.f32 1.0, %v1156_v61 }
 0x145   : > { %1163 = vrcp.f32 %v528_v62 }
 0x146   : > { %v1158_v63 = vpop.eup %1157 }
 0x147   : > { %v529_v0 = vadd.f32 1.0, %v1158_v63 }
 0x149   : > { %1165 = vrcp.f32 %v529_v0 }
 0x14a   : > { %v1160_v1 = vpop.eup %1159 }
 0x14e   : > { %v1162_v2 = vpop.eup %1161 }
 0x14f   : > { %v538_v3 = vpack.c.bf16 %v1162_v2, %v1160_v1 }
 0x151   : > { %1041 = vmatprep.mubr.bf16.mxu1 %v538_v3 }
 0x152   : > { %v1164_v4 = vpop.eup %1163 }
 0x156   : > { %v1166_v5 = vpop.eup %1165 }
 0x157   : > { %v539_v6 = vpack.c.bf16 %v1166_v5, %v1164_v4 }
 0x159   : > { %1042 = vmatmul.mubr.bf16.vlgmr.msra.gmra.mxu1 %v539_v6 }
 0x219   : > { %v1043_v16 = vpop.f32.mrf.mxu1 }
 0x21a   : > { %v654_v17 = vadd.f32 %v1043_v16, %v947_v15 }
 0x21b   : > { %v645_v18 = vpop.f32.mrf.mxu1 }
 0x21c   : > { %v646_v19 = vadd.f32 %v947_v15, %v645_v18  ;;  %v958_v20 = vmul.f32 -1.442695, %v654_v17 }
 0x21d   : > { %v1044_v21 = vpop.f32.mrf.mxu1 }
 0x21e   : > { %v956_v22 = vmul.f32 -1.442695, %v646_v19  ;;  %v657_v23 = vadd.f32 %v1044_v21, %v947_v15 }
 0x21f   : > { %v648_v24 = vpop.f32.mrf.mxu1 }
 0x220   : > { %1167 = vpow2.f32 %v956_v22  ;;  %v959_v25 = vmul.f32 -1.442695, %v657_v23  ;;  %v649_v26 = vadd.f32 %v947_v15, %v648_v24 }
 0x221   : > { %1169 = vpow2.f32 %v958_v20 }
 0x222   : > { %1171 = vpow2.f32 %v959_v25  ;;  %v957_v27 = vmul.f32 -1.442695, %v649_v26 }
 0x224   : > { %1173 = vpow2.f32 %v957_v27 }
 0x22d   : > { %v1168_v28 = vpop.eup %1167 }
 0x22e   : > { %v1170_v29 = vpop.eup %1169  ;;  %v672_v30 = vadd.f32 1.0, %v1168_v28 }
 0x22f   : > { %v1172_v31 = vpop.eup %1171  ;;  %v674_v34 = vadd.f32 1.0, %v1170_v29 }
 0x230   : > { %v675_v32 = vadd.f32 1.0, %v1172_v31  ;;  %1175 = vrcp.f32 %v672_v30 }
 0x231   : > { %v1174_v33 = vpop.eup %1173 }
 0x232   : > { %v673_v35 = vadd.f32 1.0, %v1174_v33  ;;  %1177 = vrcp.f32 %v675_v32 }
 0x234   : > { %1179 = vrcp.f32 %v673_v35 }
 0x235   : > { %1181 = vrcp.f32 %v674_v34 }
 0x23d   : > { %v1176_v36 = vpop.eup %1175 }
 0x23f   : > { %v1178_v37 = vpop.eup %1177 }
 0x241   : > { %v1180_v38 = vpop.eup %1179 }
 0x242   : > { %v1182_v39 = vpop.eup %1181  ;;  %v684_v40 = vpack.c.bf16 %v1180_v38, %v1176_v36 }
 0x243   : > { %v685_v41 = vpack.c.bf16 %v1178_v37, %v1182_v39 }
 0x244   : > { %1061 = vmatprep.mubr.bf16.mxu0 %v684_v40 }
 0x245   : > { %1062 = vmatmul.mubr.bf16.vlgmr.msra.gmra.mxu0 %v685_v41 }
 0x305   : > { %v1063_v43 = vpop.f32.mrf.mxu0 }
 0x306   : > { %v800_v44 = vadd.f32 %v1063_v43, %v960_v42 }
 0x307   : > { %v791_v45 = vpop.f32.mrf.mxu0 }
 0x308   : > { %v792_v46 = vadd.f32 %v960_v42, %v791_v45  ;;  %v971_v47 = vmul.f32 -1.442695, %v800_v44 }
 0x309   : > { %v1064_v48 = vpop.f32.mrf.mxu0 }
 0x30a   : > { %v969_v49 = vmul.f32 -1.442695, %v792_v46  ;;  %v803_v50 = vadd.f32 %v1064_v48, %v960_v42 }
 0x30b   : > { %v794_v51 = vpop.f32.mrf.mxu0 }
 0x30c   : > { %1183 = vpow2.f32 %v969_v49  ;;  %v972_v52 = vmul.f32 -1.442695, %v803_v50  ;;  %v795_v53 = vadd.f32 %v960_v42, %v794_v51 }
 0x30d   : > { %1185 = vpow2.f32 %v971_v47 }
 0x30e   : > { %1187 = vpow2.f32 %v972_v52  ;;  %v970_v54 = vmul.f32 -1.442695, %v795_v53 }
 0x310   : > { %1189 = vpow2.f32 %v970_v54 }
 0x319   : > { %v1184_v55 = vpop.eup %1183 }
 0x31a   : > { %v1186_v56 = vpop.eup %1185  ;;  %v818_v57 = vadd.f32 1.0, %v1184_v55 }
 0x31b   : > { %v1188_v58 = vpop.eup %1187  ;;  %v820_v60 = vadd.f32 1.0, %v1186_v56 }
 0x31c   : > { %1191 = vrcp.f32 %v818_v57  ;;  %v821_v61 = vadd.f32 1.0, %v1188_v58 }
 0x31d   : > { %v1190_v59 = vpop.eup %1189 }
 0x31e   : > { %v819_v62 = vadd.f32 1.0, %v1190_v59 }
 0x320   : > { %1193 = vrcp.f32 %v819_v62 }
 0x321   : > { %1195 = vrcp.f32 %v820_v60 }
 0x322   : > { %1197 = vrcp.f32 %v821_v61 }
 0x329   : > { %v1192_v63 = vpop.eup %1191 }
 0x32a   : > { %831 = vst.msk [vmem:[%s315_s24] sm:$0xff] %vm830_vm0, %v1192_v63 }
 0x32d   : > { %v1194_v0 = vpop.eup %1193 }
 0x32e   : > { %v1196_v1 = vpop.eup %1195  ;;  %832 = vst.msk [vmem:[%s315_s24 + $0x8] sm:$0xff] %vm830_vm0, %v1194_v0 }
 0x32f   : > { %v1198_v2 = vpop.eup %1197  ;;  %833 = vst.msk [vmem:[%s315_s24 + $0x10] sm:$0xff] %vm830_vm0, %v1196_v1 }
 0x330   : > { %834 = vst.msk [vmem:[%s315_s24 + $0x18] sm:$0xff] %vm830_vm0, %v1198_v2 }
 0x331 PF: > { %p18_p7 = scmp.ge.s32.totalorder %s1386_s12, 4   ;;  %s1555_s24 = smov %s1283_s25 }
 0x332   : > { %s1556_s25 = smov %s1287_s26  ;;  %s1557_s26 = smov %s1403_s20 }
 0x333   : > { %s1558_s27 = smov %s1386_s12  ;;  %20 = sbr.rel (!%p18_p7) target bundleno = 4 (0x4), region = 92 }
 0x338   :  { %857 = vsyncpa [#allocation3], 1 }
 0x339   :  { %859 = vsyncpa [#allocation3 + $0x1], 1 }
 0x33a   :  { %860 = vsyncpa [#allocation5], 1 }

</bundles_post_ra>
